<compile_context>
chip_gen: v7x
topology: tpu7x:2x2x1
jax: 0.10.0
libtpu: 0.0.40
codegen_flags: <defaults>
</compile_context>

<pallas_src>
import functools
import numpy as np

import jax
import jax.numpy as jnp
from jax import lax
from jax.experimental import pallas as pl
from jax.experimental.pallas import tpu as pltpu

_PI = float(np.pi)


def _pose_loss_kernel(label_ref, bins_ref, conf_ref, reg_ref,
                      conf_out, reg_out,
                      *, n_total, num_bins, half_range, beta, tn):
    i = pl.program_id(0)

    label = label_ref[...].astype(jnp.float32)   # (1, TN)
    bins = bins_ref[...].astype(jnp.float32)     # (B, 1)
    conf = conf_ref[...].astype(jnp.float32)     # (B, TN)
    reg = reg_ref[...].astype(jnp.float32)       # (B, TN)

    # Validity mask for zero-padded tail columns.
    col = lax.broadcasted_iota(jnp.int32, (1, tn), 1) + i * tn
    valid = (col < n_total).astype(jnp.float32)  # (1, TN)

    # ---- label2targets ----
    d = label - bins                                            # (B, TN)
    d = jnp.where(d > _PI, d - 2.0 * _PI, d)
    d = jnp.where(d < -_PI, d + 2.0 * _PI, d)
    ad = jnp.abs(d)                                             # |wrapped angle|
    # cos(d) > cos(h)  <=>  |d| < h   (cos strictly decreasing on [0, pi])
    reg_mask = (ad < half_range).astype(jnp.float32)            # (B, TN)
    # argmax cos(d) == argmin |d|  (first-occurrence convention preserved)
    bidx = lax.broadcasted_iota(jnp.int32, ad.shape, 0)
    min_ad = jnp.min(ad, axis=0, keepdims=True)
    conf_target = jnp.min(jnp.where(ad <= min_ad, bidx, num_bins),
                          axis=0, keepdims=True)                # (1, TN) int32

    # ---- conf loss: per-sample cross-entropy over bins (sublane axis) ----
    m = jnp.max(conf, axis=0, keepdims=True)
    lse = m + jnp.log(jnp.sum(jnp.exp(conf - m), axis=0, keepdims=True))
    logit_t = jnp.sum(jnp.where(bidx == conf_target, conf, 0.0),
                      axis=0, keepdims=True)
    ce = (lse - logit_t) * valid                                # (1, TN)

    # ---- reg loss: smooth L1 weighted by reg_mask, summed over bins ----
    diff = reg - d
    adiff = jnp.abs(diff)
    sl1 = jnp.where(adiff < beta, 0.5 * adiff * adiff / beta, adiff - 0.5 * beta)
    reg_sum = jnp.sum(sl1 * reg_mask, axis=0, keepdims=True) * valid  # (1, TN)

    # Lane-dense per-block partial sums; final reduce happens outside.
    conf_out[...] = ce
    reg_out[...] = reg_sum


def pose_loss_pallas(conf_value, reg_value, label, bin_centers,
                     bin_range_degree, *, tn=1024):
    n, num_bins = conf_value.shape
    # Lane tile: multiple of 128, clamped to the (padded) problem size.
    tn = max(128, min(int(tn), pl.cdiv(n, 128) * 128))
    n_pad = pl.cdiv(n, tn) * tn
    num_blocks = n_pad // tn

    # Lane-dense layout: N on lanes, bins on sublanes.
    conf_t = jnp.transpose(conf_value)                 # (B, N)
    reg_t = jnp.transpose(reg_value)                   # (B, N)
    label2d = jnp.reshape(label, (1, n))               # (1, N)
    if n_pad != n:
        pad = n_pad - n
        conf_t = jnp.pad(conf_t, ((0, 0), (0, pad)))
        reg_t = jnp.pad(reg_t, ((0, 0), (0, pad)))
        label2d = jnp.pad(label2d, ((0, 0), (0, pad)))
    bins2d = jnp.reshape(bin_centers, (num_bins, 1)).astype(jnp.float32)

    kernel = functools.partial(
        _pose_loss_kernel,
        n_total=n, num_bins=num_bins,
        half_range=float(bin_range_degree) * _PI / 360.0,
        beta=1.0, tn=tn)

    conf_part, reg_part = pl.pallas_call(
        kernel,
        out_shape=(jax.ShapeDtypeStruct((num_blocks, 1, tn), jnp.float32),
                   jax.ShapeDtypeStruct((num_blocks, 1, tn), jnp.float32)),
        grid_spec=pltpu.PrefetchScalarGridSpec(
            num_scalar_prefetch=0,
            grid=(num_blocks,),
            in_specs=[
                pl.BlockSpec((1, tn), lambda i: (0, i)),          # label (1, N)
                pl.BlockSpec((num_bins, 1), lambda i: (0, 0)),    # bin_centers (VMEM-resident)
                pl.BlockSpec((num_bins, tn), lambda i: (0, i)),   # conf_value^T
                pl.BlockSpec((num_bins, tn), lambda i: (0, i)),   # reg_value^T
            ],
            out_specs=[
                pl.BlockSpec((None, 1, tn), lambda i: (i, 0, 0)),  # conf partials
                pl.BlockSpec((None, 1, tn), lambda i: (i, 0, 0)),  # reg partials
            ],
        ),
        compiler_params=pltpu.CompilerParams(
            dimension_semantics=("parallel",)),   # independent blocks -> v7x 2-TC split
    )(label2d, bins2d, conf_t, reg_t)

    conf_loss = jnp.sum(conf_part) / jnp.float32(n)
    reg_loss = jnp.sum(reg_part) / jnp.float32(n * num_bins)
    return conf_loss, reg_loss


def _reference(conf_value, reg_value, label, bin_centers, cos_half_range):
    reg_target = label[:, None] - bin_centers[None, :]
    reg_target = jnp.where(reg_target > _PI, reg_target - 2 * _PI, reg_target)
    reg_target = jnp.where(reg_target < -_PI, reg_target + 2 * _PI, reg_target)
    rtc = jnp.cos(reg_target)
    reg_mask = (rtc > cos_half_range).astype(jnp.float32)
    conf_target = jnp.argmax(rtc, axis=1)
    logp = jax.nn.log_softmax(conf_value, axis=1)
    ce = -jnp.take_along_axis(logp, conf_target[:, None], axis=1)[:, 0]
    conf_loss = jnp.mean(ce)
    ad = jnp.abs(reg_value - reg_target)
    sl1 = jnp.where(ad < 1.0, 0.5 * ad * ad, ad - 0.5)
    reg_loss = jnp.mean(sl1 * reg_mask)
    return conf_loss, reg_loss


if __name__ == "__main__":
    key = jax.random.PRNGKey(0)
    N = 300                 # not a multiple of the lane tile -> exercises tail masking
    num_bins = 12
    bin_range_degree = 60.0

    # bin_centers buffer (matches the torch __init__)
    bc = np.arange(num_bins, dtype=np.float32) * 2.0 * np.pi / num_bins
    bc[bc > np.pi] -= 2.0 * np.pi
    bin_centers = jnp.asarray(bc)
    cos_half_range = float(np.cos(bin_range_degree * np.pi / 360.0))

    k1, k2, k3 = jax.random.split(key, 3)
    conf_value = jax.random.normal(k1, (N, num_bins), dtype=jnp.float32)
    reg_value = 0.5 * jax.random.normal(k2, (N, num_bins), dtype=jnp.float32)
    label = jax.random.uniform(k3, (N,), minval=-_PI, maxval=_PI,
                               dtype=jnp.float32)

    # tn=128 -> 3 grid steps (multi-block + padded tail path); default tn=1024
    # is the production setting for large N.
    conf_loss, reg_loss = pose_loss_pallas(
        conf_value, reg_value, label, bin_centers, bin_range_degree, tn=128)
    jax.block_until_ready((conf_loss, reg_loss))

    ref_conf, ref_reg = _reference(conf_value, reg_value, label,
                                   bin_centers, cos_half_range)
    assert np.allclose(np.asarray(conf_loss), np.asarray(ref_conf),
                       rtol=1e-5, atol=1e-5), (conf_loss, ref_conf)
    assert np.allclose(np.asarray(reg_loss), np.asarray(ref_reg),
                       rtol=1e-5, atol=1e-5), (reg_loss, ref_reg)
    print("KERNEL_OK")
</pallas_src>

<mosaic_0001>
module attributes {stable_mosaic.version = 11 : i64} {
  func.func @_pose_loss_kernel(%arg0: i32, %arg1: memref<1x128xf32, #tpu.memory_space<vmem>>, %arg2: memref<12x1xf32, #tpu.memory_space<vmem>>, %arg3: memref<12x128xf32, #tpu.memory_space<vmem>>, %arg4: memref<12x128xf32, #tpu.memory_space<vmem>>, %arg5: memref<1x1x128xf32, #tpu.memory_space<vmem>>, %arg6: memref<1x1x128xf32, #tpu.memory_space<vmem>>) attributes {dimension_semantics = [#tpu.dimension_semantics<parallel>], iteration_bounds = array<i64: 3>, scalar_prefetch = 0 : i64, scratch_operands = 0 : i64, tpu.core_type = #tpu.core_type<tc>, window_params = [{transform_indices = @transform_0, window_bounds = array<i64: 1, 128>}, {pipeline_mode = #tpu.pipeline_mode<synchronous>, transform_indices = @transform_1, window_bounds = array<i64: 12, 1>}, {transform_indices = @transform_2, window_bounds = array<i64: 12, 128>}, {transform_indices = @transform_3, window_bounds = array<i64: 12, 128>}, {transform_indices = @transform_4, window_bounds = array<i64: 1, 1, 128>}, {transform_indices = @transform_5, window_bounds = array<i64: 1, 1, 128>}]} {
    %c0 = arith.constant 0 : index
    %c0_0 = arith.constant 0 : index
    %0 = vector.load %arg1[%c0, %c0_0] : memref<1x128xf32, #tpu.memory_space<vmem>>, vector<1x128xf32>
    %c0_1 = arith.constant 0 : index
    %c0_2 = arith.constant 0 : index
    %1 = vector.load %arg2[%c0_1, %c0_2] : memref<12x1xf32, #tpu.memory_space<vmem>>, vector<12x1xf32>
    %c0_3 = arith.constant 0 : index
    %c0_4 = arith.constant 0 : index
    %2 = vector.load %arg3[%c0_3, %c0_4] : memref<12x128xf32, #tpu.memory_space<vmem>>, vector<12x128xf32>
    %c0_5 = arith.constant 0 : index
    %c0_6 = arith.constant 0 : index
    %3 = vector.load %arg4[%c0_5, %c0_6] : memref<12x128xf32, #tpu.memory_space<vmem>>, vector<12x128xf32>
    %4 = tpu.iota {dimensions = array<i32: 1>} : vector<1x128xi32>
    %c128_i32 = arith.constant 128 : i32
    %5 = arith.muli %arg0, %c128_i32 : i32
    %6 = vector.broadcast %5 : i32 to vector<1x128xi32>
    %7 = arith.addi %4, %6 : vector<1x128xi32>
    %c300_i32 = arith.constant 300 : i32
    %8 = vector.broadcast %c300_i32 : i32 to vector<1x128xi32>
    %9 = arith.cmpi slt, %7, %8 : vector<1x128xi32>
    %10 = arith.extui %9 : vector<1x128xi1> to vector<1x128xi32>
    %11 = arith.sitofp %10 : vector<1x128xi32> to vector<1x128xf32>
    %12 = vector.broadcast %0 : vector<1x128xf32> to vector<12x128xf32>
    %13 = vector.broadcast %1 : vector<12x1xf32> to vector<12x128xf32>
    %14 = arith.subf %12, %13 : vector<12x128xf32>
    %cst = arith.constant 3.14159274 : f32
    %15 = vector.broadcast %cst : f32 to vector<12x128xf32>
    %16 = arith.cmpf ogt, %14, %15 : vector<12x128xf32>
    %cst_7 = arith.constant 6.28318548 : f32
    %17 = vector.broadcast %cst_7 : f32 to vector<12x128xf32>
    %18 = arith.subf %14, %17 : vector<12x128xf32>
    %19 = arith.select %16, %18, %14 : vector<12x128xi1>, vector<12x128xf32>
    %cst_8 = arith.constant -3.14159274 : f32
    %20 = vector.broadcast %cst_8 : f32 to vector<12x128xf32>
    %21 = arith.cmpf olt, %19, %20 : vector<12x128xf32>
    %cst_9 = arith.constant 6.28318548 : f32
    %22 = vector.broadcast %cst_9 : f32 to vector<12x128xf32>
    %23 = arith.addf %19, %22 : vector<12x128xf32>
    %24 = arith.select %21, %23, %19 : vector<12x128xi1>, vector<12x128xf32>
    %25 = math.absf %24 : vector<12x128xf32>
    %cst_10 = arith.constant 0.52359879 : f32
    %26 = vector.broadcast %cst_10 : f32 to vector<12x128xf32>
    %27 = arith.cmpf olt, %25, %26 : vector<12x128xf32>
    %28 = arith.extui %27 : vector<12x128xi1> to vector<12x128xi32>
    %29 = arith.sitofp %28 : vector<12x128xi32> to vector<12x128xf32>
    %30 = tpu.iota {dimensions = array<i32: 0>} : vector<12x128xi32>
    %cst_11 = arith.constant dense<0x7F800000> : vector<128xf32>
    %31 = vector.multi_reduction <minimumf>, %25, %cst_11 [0] : vector<12x128xf32> to vector<128xf32>
    %32 = vector.shape_cast %31 : vector<128xf32> to vector<1x128xf32>
    %33 = vector.broadcast %32 : vector<1x128xf32> to vector<12x128xf32>
    %34 = arith.cmpf ole, %25, %33 : vector<12x128xf32>
    %c12_i32 = arith.constant 12 : i32
    %35 = vector.broadcast %c12_i32 : i32 to vector<12x128xi32>
    %36 = arith.select %34, %30, %35 : vector<12x128xi1>, vector<12x128xi32>
    %cst_12 = arith.constant dense<2147483647> : vector<128xi32>
    %37 = vector.multi_reduction <minsi>, %36, %cst_12 [0] : vector<12x128xi32> to vector<128xi32>
    %38 = vector.shape_cast %37 : vector<128xi32> to vector<1x128xi32>
    %cst_13 = arith.constant dense<0xFF800000> : vector<128xf32>
    %39 = vector.multi_reduction <maximumf>, %2, %cst_13 [0] : vector<12x128xf32> to vector<128xf32>
    %40 = vector.shape_cast %39 : vector<128xf32> to vector<1x128xf32>
    %41 = vector.broadcast %40 : vector<1x128xf32> to vector<12x128xf32>
    %42 = arith.subf %2, %41 : vector<12x128xf32>
    %43 = math.exp %42 : vector<12x128xf32>
    %cst_14 = arith.constant dense<0.000000e+00> : vector<128xf32>
    %44 = vector.multi_reduction <add>, %43, %cst_14 [0] : vector<12x128xf32> to vector<128xf32>
    %45 = vector.shape_cast %44 : vector<128xf32> to vector<1x128xf32>
    %46 = math.log %45 : vector<1x128xf32>
    %47 = arith.addf %40, %46 : vector<1x128xf32>
    %48 = vector.broadcast %38 : vector<1x128xi32> to vector<12x128xi32>
    %49 = arith.cmpi eq, %30, %48 : vector<12x128xi32>
    %cst_15 = arith.constant 0.000000e+00 : f32
    %50 = vector.broadcast %cst_15 : f32 to vector<12x128xf32>
    %51 = arith.select %49, %2, %50 : vector<12x128xi1>, vector<12x128xf32>
    %cst_16 = arith.constant dense<0.000000e+00> : vector<128xf32>
    %52 = vector.multi_reduction <add>, %51, %cst_16 [0] : vector<12x128xf32> to vector<128xf32>
    %53 = vector.shape_cast %52 : vector<128xf32> to vector<1x128xf32>
    %54 = arith.subf %47, %53 : vector<1x128xf32>
    %55 = arith.mulf %54, %11 : vector<1x128xf32>
    %56 = arith.subf %3, %24 : vector<12x128xf32>
    %57 = math.absf %56 : vector<12x128xf32>
    %cst_17 = arith.constant 1.000000e+00 : f32
    %58 = vector.broadcast %cst_17 : f32 to vector<12x128xf32>
    %59 = arith.cmpf olt, %57, %58 : vector<12x128xf32>
    %cst_18 = arith.constant 5.000000e-01 : f32
    %60 = vector.broadcast %cst_18 : f32 to vector<12x128xf32>
    %61 = arith.mulf %60, %57 : vector<12x128xf32>
    %62 = arith.mulf %61, %57 : vector<12x128xf32>
    %cst_19 = arith.constant 1.000000e+00 : f32
    %63 = vector.broadcast %cst_19 : f32 to vector<12x128xf32>
    %64 = arith.divf %62, %63 : vector<12x128xf32>
    %cst_20 = arith.constant 5.000000e-01 : f32
    %65 = vector.broadcast %cst_20 : f32 to vector<12x128xf32>
    %66 = arith.subf %57, %65 : vector<12x128xf32>
    %67 = arith.select %59, %64, %66 : vector<12x128xi1>, vector<12x128xf32>
    %68 = arith.mulf %67, %29 : vector<12x128xf32>
    %cst_21 = arith.constant dense<0.000000e+00> : vector<128xf32>
    %69 = vector.multi_reduction <add>, %68, %cst_21 [0] : vector<12x128xf32> to vector<128xf32>
    %70 = vector.shape_cast %69 : vector<128xf32> to vector<1x128xf32>
    %71 = arith.mulf %70, %11 : vector<1x128xf32>
    %c0_22 = arith.constant 0 : index
    %c0_23 = arith.constant 0 : index
    %c0_24 = arith.constant 0 : index
    %72 = vector.load %arg5[%c0_22, %c0_23, %c0_24] : memref<1x1x128xf32, #tpu.memory_space<vmem>>, vector<1x1x128xf32>
    %73 = vector.shape_cast %72 : vector<1x1x128xf32> to vector<1x128xf32>
    %74 = vector.shape_cast %55 : vector<1x128xf32> to vector<1x1x128xf32>
    tpu.vector_store %arg5[%c0_22, %c0_23, %c0_24], %74 {strides = array<i32>} : memref<1x1x128xf32, #tpu.memory_space<vmem>>, vector<1x1x128xf32>,
    %c0_25 = arith.constant 0 : index
    %c0_26 = arith.constant 0 : index
    %c0_27 = arith.constant 0 : index
    %75 = vector.load %arg6[%c0_25, %c0_26, %c0_27] : memref<1x1x128xf32, #tpu.memory_space<vmem>>, vector<1x1x128xf32>
    %76 = vector.shape_cast %75 : vector<1x1x128xf32> to vector<1x128xf32>
    %77 = vector.shape_cast %71 : vector<1x128xf32> to vector<1x1x128xf32>
    tpu.vector_store %arg6[%c0_25, %c0_26, %c0_27], %77 {strides = array<i32>} : memref<1x1x128xf32, #tpu.memory_space<vmem>>, vector<1x1x128xf32>,
    return
  }
  func.func @transform_0(%arg0: i32) -> (i32, i32) {
    %c0_i32 = arith.constant 0 : i32
    %c0_i32_0 = arith.constant 0 : i32
    return %c0_i32, %arg0 : i32, i32
  }
  func.func @transform_1(%arg0: i32) -> (i32, i32) {
    %c0_i32 = arith.constant 0 : i32
    %c0_i32_0 = arith.constant 0 : i32
    %c0_i32_1 = arith.constant 0 : i32
    return %c0_i32, %c0_i32_0 : i32, i32
  }
  func.func @transform_2(%arg0: i32) -> (i32, i32) {
    %c0_i32 = arith.constant 0 : i32
    %c0_i32_0 = arith.constant 0 : i32
    return %c0_i32, %arg0 : i32, i32
  }
  func.func @transform_3(%arg0: i32) -> (i32, i32) {
    %c0_i32 = arith.constant 0 : i32
    %c0_i32_0 = arith.constant 0 : i32
    return %c0_i32, %arg0 : i32, i32
  }
  func.func @transform_4(%arg0: i32) -> (i32, i32, i32) {
    %c0_i32 = arith.constant 0 : i32
    %c0_i32_0 = arith.constant 0 : i32
    %c0_i32_1 = arith.constant 0 : i32
    return %arg0, %c0_i32, %c0_i32_0 : i32, i32, i32
  }
  func.func @transform_5(%arg0: i32) -> (i32, i32, i32) {
    %c0_i32 = arith.constant 0 : i32
    %c0_i32_0 = arith.constant 0 : i32
    %c0_i32_1 = arith.constant 0 : i32
    return %arg0, %c0_i32, %c0_i32_0 : i32, i32, i32
  }
}

</mosaic_0001>

<bundles_post_ra>
// kernel: tpu_custom_call.1
= control target key start
LH: loop header
LB: loop body
LE: loop exit
PB: predicated region body
PF: predicated region fallthrough
CT: control target
= control target key end

     0   :  { %s1207_s0 = inlined_call_operand.vmem [shape: f32[1,384], index: 0, kind: input, shape index: {}]   ;;  %s1208_s1 = inlined_call_operand.vmem [shape: f32[12,1], index: 1, kind: input, shape index: {}]   ;;  %s1209_s2 = inlined_call_operand.hbm [shape: f32[12,384], index: 2, kind: input, shape index: {}]   ;;  %s1210_s3 = inlined_call_operand.hbm [shape: f32[12,384], index: 3, kind: input, shape index: {}]   ;;  %s1211_s4 = inlined_call_operand.hbm [shape: f32[3,1,128], index: 4, kind: output, shape index: {0}]   ;;  %s1212_s5 = inlined_call_operand.hbm [shape: f32[3,1,128], index: 5, kind: output, shape index: {1}]  }
   0x1   :  { %1216 = sst [smem:[#allocation14_spill]] %s1209_s2 }
   0x2   :  { %11 = vsyncpa [#allocation3], 0 }
   0x3   :  { %13 = vsyncpa [#allocation3 + $0x1], 0 }
   0x4   :  { %14 = vsyncpa [#allocation6], 0 }
   0x5   :  { %16 = vsyncpa [#allocation6 + $0x1], 0 }
   0x6   :  { %17 = vsyncpa [#allocation4], 0 }
   0x7   :  { %19 = vsyncpa [#allocation4 + $0x1], 0 }
   0x8   :  { %20 = vsyncpa [#allocation9], 0 }
   0x9   :  { %22 = vsyncpa [#allocation9 + $0x1], 0  ;;  %s901_s18 = smov 0   ;;  %s903_s19 = smov 0  }
   0xa   :  { %s905_s20 = smov 0   ;;  %s907_s21 = smov 0  }
   0xb LB: > { %s922_s22 = sadd.s32 4294967295, %s860_s21   ;;  %s607_s23 = sadd.s32 4294967294, %s860_s21   ;;  %s860_s21 = sphi %s907_s21, %s1232_s21   ;;  %s856_s20 = sphi %s905_s20, %s1231_s20   ;;  %s852_s19 = sphi %s903_s19, %s1230_s19   ;;  %s848_s18 = sphi %s901_s18, %s1229_s18  }
   0xc   : > { %s926_s24 = sadd.s32 1, %s860_s21   ;;  %s82_s25 = sadd.s32 1, %s856_s20 }
   0xd   : > { %s79_s26 = ssub.s32 %s860_s21, %s926_s24  ;;  %p89_p0 = scmp.ne.s32.totalorder %s856_s20, %s852_s19 }
   0xe   : > { %p80_p1 = scmp.eq.s32.totalorder %s79_s26, 0  ;;  %p90_p2 = scmp.eq.s32.totalorder %s860_s21, 0 }
   0xf   : > { %p95_p3 = scmp.ne.s32.totalorder %s852_s19, %s848_s18  ;;  %p96_p4 = scmp.eq.s32.totalorder %s922_s22, 0 }
  0x10   : > { %s938_s27 = scalar_select %p80_p1, %s856_s20, %s82_s25  }
  0x11   : > { %p940_p5 = por %p90_p2, %p89_p0  ;;  %p944_p6 = por %p96_p4, %p95_p3 }
  0x12   : > { %p145_p7 = scmp.eq.s32.totalorder %s922_s22, 2  ;;  %p151_p8 = scmp.eq.s32.totalorder %s607_s23, 2 }
  0x13   : > { %s1218_s29 = scalar_select %p944_p6, 1, 0 }
  0x14   : > { %p652_p9 = scmp.lt.s32.totalorder %s860_s21, 3  ;;  %p950_p10 = por %p145_p7, %p89_p0 }
  0x15   : > { %p954_p11 = por %p151_p8, %p95_p3  ;;  %s959_s7 = sand.u32 1, %s856_s20  }
  0x16   : > { %s1219_s30 = scalar_select %p950_p10, 1, 0 }
  0x17   : > { %s1220_s6 = scalar_select %p954_p11, 1, 0 }
  0x18   : > { %s611_s8 = sshll.u32 %s860_s21, 7  ;;  %s610_s9 = sshll.u32 %s959_s7, 4 }
  0x19   : > { %s1221_s2 = sld [smem:[#allocation14_spill]]  ;;  %s210_s13 = scalar_lea.vmem [#allocation2], %s610_s9 }
  0x1a   : > { %s216_s14 = sshll.u32 %s210_s13, 4  ;;  %p974_p12 = pnand %p652_p9, %p940_p5  ;;  %s978_s14 = int_to_ptr.vmem [resolvable:$true] %s216_s14 }
  0x1b   : > { %s207_s16 = scalar_lea.sflag [#allocation3], %s959_s7 }
  0x1c   : > { %p700_p1 = pneg %p974_p12 }
  0x1f   : > { %s968_s12 = scalar_lea.hbm %s1221_s2, %s611_s8  ;;  %s703_s26 = scalar_lea.hbm %s1221_s2, 768 }
  0x20   : > { %s698_s17 = scalar_lea.hbm %s968_s12, 256  ;;  %p704_p4 = scmp.lt.u32.totalorder %s968_s12, %s1221_s2 }
  0x21   : > { %p699_p0 = scmp.ne.s32.totalorder %s968_s12, %s698_s17  ;;  %p705_p5 = scmp.lt.u32.totalorder %s703_s26, %s698_s17 }
  0x22   : > { %p707_p8 = scmp.lt.u32.totalorder %s698_s17, %s968_s12 }
  0x23   : > { %p701_p2 = pnand %p700_p1, %p699_p0  ;;  %p706_p7 = por %p705_p5, %p704_p4 }
  0x25   : > { %p702_p3 = pneg %p701_p2  ;;  %p708_p9 = por %p707_p8, %p706_p7 }
  0x27   : > { %p709_p13 = pnand %p708_p9, %p702_p3 }
  0x29   : > { %712 = shalt.err (!%p709_p13)
}
  0x2a   : > { %s713_s11 = scalar_lea.vmem %s978_s14, 256  ;;  %s862_s13 = smov [#allocation2]  }
  0x2b   : > { %p714_p0 = scmp.ne.s32.totalorder %s978_s14, %s713_s11  ;;  %s718_s23 = sshll.u32 %s862_s13, 4  ;;  %s719_s23 = int_to_ptr.vmem [resolvable:$false] %s718_s23 }
  0x2c   : > { %s720_s25 = scalar_lea.vmem %s719_s23, 512  ;;  %p721_p10 = scmp.lt.s32.totalorder %s978_s14, %s719_s23 }
  0x2d   : > { %p716_p2 = pnand %p714_p0, %p700_p1  ;;  %p722_p4 = scmp.lt.s32.totalorder %s720_s25, %s713_s11 }
  0x2f   : > { %p717_p11 = pneg %p716_p2  ;;  %p723_p5 = por %p722_p4, %p721_p10 }
  0x31   : > { %p724_p7 = pnand %p723_p5, %p717_p11 }
  0x33   : > { %727 = shalt.err (!%p724_p7)
}
  0x34   : > { %s1214_s17 = smov 384   ;;  %s864_s26 = smov 128  }
  0x35   : > { %s865_s28 = smov 8   ;;  %p244_p10 = scmp.lt.s32.totalorder %s860_s21, 4 }
  0x36   : > { %641 = dma.hbm_to_vmem [thread:$0]  (!%p974_p12), %s968_s12, 256, %s978_s14, %s207_s16, %s1214_s17, %s864_s26, %s865_s28  }
  0x37   : > { %s1018_s13 = scalar_lea.hbm %s1210_s3, %s611_s8  ;;  %p1223_p11 = scmp.ge.s32.totalorder %s860_s21, 1 }
  0x38   : > { %s230_s25 = scalar_lea.vmem [#allocation5], %s610_s9  ;;  %s227_s12 = scalar_lea.sflag [#allocation6], %s959_s7 }
  0x39   : > { %p1022_p13 = pnand %p1223_p11, %p244_p10  ;;  %s236_s2 = sshll.u32 %s230_s25, 4  ;;  %s1028_s2 = int_to_ptr.vmem [resolvable:$true] %s236_s2 }
  0x3a   : > { %s728_s14 = scalar_lea.hbm %s1018_s13, 256  ;;  %s733_s10 = scalar_lea.hbm %s1210_s3, 768 }
  0x3b   : > { %p729_p3 = scmp.ne.s32.totalorder %s1018_s13, %s728_s14  ;;  %p734_p0 = scmp.lt.u32.totalorder %s1018_s13, %s1210_s3 }
  0x3c   : > { %p735_p2 = scmp.lt.u32.totalorder %s733_s10, %s728_s14  ;;  %p737_p5 = scmp.lt.u32.totalorder %s728_s14, %s1018_s13 }
  0x3d   : > { %p731_p8 = pnand %p729_p3, %p700_p1 }
  0x3e   : > { %p736_p4 = por %p735_p2, %p734_p0 }
  0x3f   : > { %p732_p9 = pneg %p731_p8 }
  0x40   : > { %p738_p7 = por %p737_p5, %p736_p4 }
  0x42   : > { %p739_p10 = pnand %p738_p7, %p732_p9 }
  0x44   : > { %742 = shalt.err (!%p739_p10)
}
  0x45   : > { %s743_s9 = scalar_lea.vmem %s1028_s2, 256  ;;  %s866_s25 = smov [#allocation5]  }
  0x46   : > { %p744_p11 = scmp.ne.s32.totalorder %s1028_s2, %s743_s9  ;;  %s748_s8 = sshll.u32 %s866_s25, 4  ;;  %s749_s8 = int_to_ptr.vmem [resolvable:$false] %s748_s8 }
  0x47   : > { %s750_s17 = scalar_lea.vmem %s749_s8, 512  ;;  %p751_p6 = scmp.lt.s32.totalorder %s1028_s2, %s749_s8 }
  0x48   : > { %p746_p3 = pnand %p744_p11, %p700_p1  ;;  %p752_p0 = scmp.lt.s32.totalorder %s750_s17, %s743_s9 }
  0x4a   : > { %p747_p8 = pneg %p746_p3  ;;  %p753_p2 = por %p752_p0, %p751_p6 }
  0x4c   : > { %p754_p4 = pnand %p753_p2, %p747_p8 }
  0x4e   : > { %757 = shalt.err (!%p754_p4)
}
  0x4f   : > { %s1225_s14 = smov 384   ;;  %248 = sbr.rel (%p1022_p13) target bundleno = 310 (0x136), region = 36 }
  0x50   : > { %644 = dma.hbm_to_vmem [thread:$0]  (!%p974_p12), %s1018_s13, 256, %s1028_s2, %s227_s12, %s1225_s14, %s864_s26, %s865_s28  }
  0x51   : > { %s1062_s16 = sand.u32 (!%p1022_p13), 1, %s852_s19   ;;  %p1226_p6 = scmp.ne.s32.totalorder (!%p1022_p13), %s1218_s29, 0 }
  0x52   : > { %s615_s10 = sshll.u32 (!%p1022_p13), %s1062_s16, 4  ;;  %s251_s11 = scalar_lea.sflag (!%p1022_p13), [#allocation3], %s1062_s16 }
  0x53   : > { %s254_s15 = scalar_lea.vmem (!%p1022_p13), [#allocation2], %s615_s10 }
  0x56   : > { %831 = dma.done.wait (%p1226_p6), %s251_s11, 256  }
  0x57   : > { %833 = vsyncadd (%p1226_p6), %s251_s11, 4294967040  ;;  %s260_s2 = scalar_lea.sflag [#allocation6], %s1062_s16  ;;  %s1071_s7 = scalar_lea.vmem [#allocation5], %s615_s10 }
  0x58   : > { %835 = dma.done.wait (%p1226_p6), %s260_s2, 256  }
  0x59   : > { %837 = vsyncadd (%p1226_p6), %s260_s2, 4294967040  ;;  %v867_v0 = vmov 0   ;;  %v306_v1 = vld [vmem:[%s1208_s1 + $0x8] sm:$0xf]  ;;  %v305_v2 = vld [vmem:[%s1208_s1] sm:$0xff]  ;;  %vm360_vm0 = vcmask 1043456   ;;  %v311_v49 = vlaneseq }
  0x5a   : > { %691 = vset.pattern.permute.xlu0 %v867_v0  ;;  %v1083_v3 = vld [vmem:[%s254_s15 + $0x8] sm:$0xf]  ;;  %v1085_v4 = vld [vmem:[%s254_s15] sm:$0xff]  ;;  %p301_p12 = scmp.lt.s32.totalorder %s922_s22, 2  ;;  %v868_v53 = vmov 0.0   ;;  %s617_s8 = sshll.u32 %s922_s22, 7 }
  0x5b   : > { %332 = vperm.xlu0 %691, %v306_v1   ;;  %v385_v5 = vsel %vm360_vm0, %v1083_v3, -inf  ;;  %v310_v24 = vld [vmem:[%s1071_s7 + $0x8] sm:$0xf]  ;;  %v309_v35 = vld [vmem:[%s1071_s7] sm:$0xff]  ;;  %v1105_v59 = vshrl.u32 %v311_v49, 7  ;;  %s626_s17 = sshll.u32 %s922_s22, 4 }
  0x5c   : > { %v386_v6 = vmax.f32 %v1085_v4, %v385_v5  ;;  %s302_s29 = scalar_select %p301_p12, %s922_s22, 2  ;;  %v312_v5 = vand.u32 127, %v311_v49 }
  0x5d   : > { %s300_s14 = scalar_lea.vmem [#allocation8], %s1062_s16  ;;  %s1125_s2 = scalar_lea.hbm %s1212_s5, %s626_s17 }
  0x5e   : > { %v387_v7 = vrot.slane %v386_v6, 4  ;;  %s303_s25 = scalar_lea.vmem %s1207_s0, %s302_s29  ;;  %s481_s10 = sshll.u32 %s300_s14, 4  ;;  %s1127_s10 = int_to_ptr.vmem [resolvable:$true] %s481_s10 }
  0x5f   : > { %327 = vperm.xlu0 %691, %v305_v2   ;;  %v619_v17 = vld [vmem:[%s303_s25] ss:$0 sm:$0xff]  ;;  %s456_s7 = scalar_lea.sflag [#allocation9], %s1062_s16  ;;  %s758_s26 = scalar_lea.vmem %s1127_s10, 16 }
  0x60   : > { %v388_v8 = vmax.f32 %v386_v6, %v387_v7  ;;  %v1110_v7 = vadd.s32 8, %v1105_v59  ;;  %p759_p1 = scmp.ne.s32.totalorder %s1127_s10, %s758_s26  ;;  %p1227_p13 = scmp.ne.s32.totalorder %s1219_s30, 0 }
  0x61   : > { %s869_s28 = smov [#allocation8]  }
  0x62   : > { %v389_v9 = vrot.slane %v388_v8, 2  ;;  %p760_p9 = pnand %p759_p1, %p1227_p13  ;;  %s762_s13 = sshll.u32 %s869_s28, 4  ;;  %s763_s13 = int_to_ptr.vmem [resolvable:$false] %s762_s13 }
  0x63   : > { %s764_s23 = scalar_lea.vmem %s763_s13, 32  ;;  %p765_p7 = scmp.lt.s32.totalorder %s1127_s10, %s763_s13 }
  0x64   : > { %v390_v10 = vmax.f32 %v388_v8, %v389_v9  ;;  %v314_v8 = vstv %s617_s8  ;;  %p761_p5 = pneg %p760_p9  ;;  %p766_p10 = scmp.lt.s32.totalorder %s764_s23, %s758_s26 }
  0x66   : > { %v391_v11 = vrot.slane %v390_v10, 1  ;;  %p767_p11 = por %p766_p10, %p765_p7 }
  0x68   : > { %v1090_v12 = vmax.f32 %v390_v10, %v391_v11  ;;  %p768_p3 = pnand %p767_p11, %p761_p5 }
  0x6a   : > { %v394_v13 = vsub.f32 %v1083_v3, %v1090_v12  ;;  %v393_v14 = vsub.f32 %v1085_v4, %v1090_v12 }
  0x6c   : > { %v397_v15 = vmul.f32 1.442695, %v394_v13  ;;  %v395_v16 = vmul.f32 1.442695, %v393_v14  ;;  %v315_v13 = vadd.s32 %v314_v8, %v312_v5 }
  0x6e   : > { %692 = vpow2.f32 %v397_v15  ;;  %vm316_vm12 = vcmp.lt.s32.totalorder %v315_v13, 300 }
  0x6f   : > { %694 = vpow2.f32 %v395_v16 }
  0x78   : > { %v693_v27 = vpop.eup %692 }
  0x79   : > { %v695_v33 = vpop.eup %694  ;;  %v399_v36 = vsel %vm360_vm0, %v693_v27, 0.0 }
  0x7a   : > { %v400_v42 = vadd.f32 %v695_v33, %v399_v36 }
  0x7c   : > { %v401_v51 = vrot.slane %v400_v42, 4 }
  0x7e   : > { %v402_v61 = vadd.f32 %v401_v51, %v400_v42 }
  0x80   : > { %v403_v9 = vrot.slane %v402_v61, 2 }
  0xda   : > { %v333_v18 = vpop.permute.xlu0 %332 }
  0xdb   : > { %v336_v19 = vsub.f32 %v619_v17, %v333_v18 }
  0xdd   : > { %vm338_vm1 = vcmp.gt.f32.partialorder %v336_v19, 3.1415927  ;;  %v621_v20 = vadd.f32 -6.2831855, %v336_v19 }
  0xde   : > { %v328_v21 = vpop.permute.xlu0 %327 }
  0xdf   : > { %v342_v22 = vsel %vm338_vm1, %v621_v20, %v336_v19  ;;  %v335_v23 = vsub.f32 %v619_v17, %v328_v21  ;;  %v404_v17 = vadd.f32 %v403_v9, %v402_v61 }
  0xe0   : > { %vm344_vm2 = vcmp.lt.f32.partialorder %v342_v22, -3.1415927  ;;  %v346_v25 = vadd.f32 6.2831855, %v342_v22 }
  0xe1   : > { %vm337_vm3 = vcmp.gt.f32.partialorder %v335_v23, 3.1415927  ;;  %v620_v26 = vadd.f32 -6.2831855, %v335_v23 }
  0xe2   : > { %v348_v28 = vsel %vm344_vm2, %v346_v25, %v342_v22  ;;  %v1115_v25 = vsel %vm316_vm12, 1.0, %v868_v53 }
  0xe3   : > { %v425_v29 = vsub.f32 %v310_v24, %v348_v28  ;;  %v341_v30 = vsel %vm337_vm3, %v620_v26, %v335_v23  ;;  %v350_v31 = vand.u32 2147483647, %v348_v28  ;;  %v405_v23 = vrot.slane %v404_v17, 1 }
  0xe4   : > { %vm343_vm4 = vcmp.lt.f32.partialorder %v341_v30, -3.1415927  ;;  %v345_v32 = vadd.f32 6.2831855, %v341_v30 }
  0xe5   : > { %v427_v34 = vand.u32 2147483647, %v425_v29  ;;  %v361_v40 = vsel %vm360_vm0, %v350_v31, inf  ;;  %vm352_vm5 = vcmp.lt.f32.partialorder %v350_v31, 0.5235988  ;;  %v406_v29 = vadd.f32 %v405_v23, %v404_v17 }
  0xe6   : > { %v347_v37 = vsel %vm343_vm4, %v345_v32, %v341_v30  ;;  %v623_v54 = vsel %vm352_vm5, 1.0, %v868_v53 }
  0xe7   : > { %v431_v38 = vmul.f32 0.5, %v427_v34  ;;  %v349_v39 = vand.u32 2147483647, %v347_v37  ;;  %v424_v41 = vsub.f32 %v309_v35, %v347_v37  ;;  %v625_v44 = vadd.f32 -0.5, %v427_v34 }
  0xe8   : > { %vm429_vm6 = vcmp.lt.f32.partialorder %v427_v34, 1.0  ;;  %696 = vlog2.f32 %v406_v29 }
  0xe9   : > { %v433_v43 = vmul.f32 %v431_v38, %v427_v34  ;;  %v362_v45 = vmin.f32 %v349_v39, %v361_v40  ;;  %v426_v46 = vand.u32 2147483647, %v424_v41  ;;  %vm351_vm7 = vcmp.lt.f32.partialorder %v349_v39, 0.5235988 }
  0xea   : > { %v622_v60 = vsel %vm351_vm7, 1.0, %v868_v53 }
  0xeb   : > { %v363_v47 = vrot.slane %v362_v45, 4  ;;  %v437_v48 = vsel %vm429_vm6, %v433_v43, %v625_v44  ;;  %v430_v50 = vmul.f32 0.5, %v426_v46  ;;  %v624_v56 = vadd.f32 -0.5, %v426_v46 }
  0xec   : > { %v439_v57 = vmul.f32 %v623_v54, %v437_v48  ;;  %vm428_vm8 = vcmp.lt.f32.partialorder %v426_v46, 1.0 }
  0xed   : > { %v364_v52 = vmin.f32 %v362_v45, %v363_v47  ;;  %v432_v55 = vmul.f32 %v430_v50, %v426_v46 }
  0xee   : > { %v440_v1 = vsel %vm360_vm0, %v439_v57, 0.0 }
  0xef   : > { %v365_v58 = vrot.slane %v364_v52, 2  ;;  %v436_v62 = vsel %vm428_vm8, %v432_v55, %v624_v56 }
  0xf0   : > { %v438_v0 = vmul.f32 %v622_v60, %v436_v62 }
  0xf1   : > { %v366_v63 = vmin.f32 %v364_v52, %v365_v58 }
  0xf2   : > { %v441_v6 = vadd.f32 %v440_v1, %v438_v0 }
  0xf3   : > { %v367_v2 = vrot.slane %v366_v63, 1 }
  0xf4   : > { %v442_v11 = vrot.slane %v441_v6, 4 }
  0xf5   : > { %v368_v10 = vmin.f32 %v366_v63, %v367_v2 }
  0xf6   : > { %v443_v14 = vadd.f32 %v442_v11, %v441_v6 }
  0xf7   : > { %vm369_vm9 = vcmp.le.f32.partialorder %v349_v39, %v368_v10  ;;  %vm370_vm10 = vcmp.le.f32.partialorder %v350_v31, %v368_v10 }
  0xf8   : > { %v371_v15 = vsel %vm369_vm9, %v1105_v59, 12  ;;  %v372_v16 = vsel %vm370_vm10, %v1110_v7, 12  ;;  %v444_v19 = vrot.slane %v443_v14, 2 }
  0xf9   : > { %v373_v18 = vsel %vm360_vm0, %v372_v16, 2147483647 }
  0xfa   : > { %vm374_vm11 = vcmp.lt.s32.totalorder %v371_v15, %v373_v18  ;;  %v445_v21 = vadd.f32 %v444_v19, %v443_v14 }
  0xfb   : > { %v375_v20 = vsel %vm374_vm11, %v371_v15, %v373_v18 }
  0xfc   : > { %v376_v22 = vrot.slane %v375_v20, 4  ;;  %v446_v24 = vrot.slane %v445_v21, 1 }
  0xfe   : > { %vm377_vm13 = vcmp.lt.s32.totalorder %v375_v20, %v376_v22  ;;  %v447_v27 = vadd.f32 %v446_v24, %v445_v21 }
  0xff   : > { %v378_v26 = vsel %vm377_vm13, %v375_v20, %v376_v22 }
 0x100   : > { %v379_v28 = vrot.slane %v378_v26, 2  ;;  %v448_v30 = vmul.f32 %v1115_v25, %v447_v27 }
 0x102   : > { %vm380_vm14 = vcmp.lt.s32.totalorder %v378_v26, %v379_v28  ;;  %450 = vst [vmem:[%s300_s14] sm:$0x1] %v448_v30 }
 0x103   : > { %v381_v31 = vsel %vm380_vm14, %v378_v26, %v379_v28 }
 0x104   : > { %v382_v32 = vrot.slane %v381_v31, 1 }
 0x105   : > { %771 = shalt.err (!%p768_p3)
}
 0x106   : > { %s772_s29 = scalar_lea.hbm %s1125_s2, 16  ;;  %s776_s25 = scalar_lea.hbm %s1212_s5, 48 }
 0x107   : > { %p773_p8 = scmp.ne.s32.totalorder %s1125_s2, %s772_s29  ;;  %p777_p4 = scmp.lt.u32.totalorder %s1125_s2, %s1212_s5 }
 0x108   : > { %p778_p6 = scmp.lt.u32.totalorder %s776_s25, %s772_s29  ;;  %p780_p1 = scmp.lt.u32.totalorder %s772_s29, %s1125_s2 }
 0x109   : > { %p774_p0 = pnand %p773_p8, %p1227_p13 }
 0x10a   : > { %p779_p12 = por %p778_p6, %p777_p4 }
 0x10b   : > { %p775_p2 = pneg %p774_p0 }
 0x10c   : > { %p781_p9 = por %p780_p1, %p779_p12 }
 0x10e   : > { %p782_p5 = pnand %p781_p9, %p775_p2 }
 0x110   : > { %785 = shalt.err (!%p782_p5)
}
 0x111   : > { %635 = dma.vmem_to_hbm [thread:$0]  (%p1227_p13), %s1127_s10, 16, %s1125_s2, %s456_s7   ;;  %vm383_vm15 = vcmp.lt.s32.totalorder %v381_v31, %v382_v32  ;;  %v697_v39 = vpop.eup %696 }
 0x112   : > { %v384_v33 = vsel %vm383_vm15, %v381_v31, %v382_v32  ;;  %v408_v41 = vmul.f32 0.6931472, %v697_v39  ;;  %s294_s10 = scalar_lea.vmem [#allocation7], %s1062_s16  ;;  %s1164_s7 = scalar_lea.hbm %s1211_s4, %s626_s17 }
 0x113   : > { %vm411_vm1 = vcmp.eq.s32.totalorder %v1110_v7, %v384_v33  ;;  %vm410_vm2 = vcmp.eq.s32.totalorder %v1105_v59, %v384_v33  ;;  %s468_s11 = sshll.u32 %s294_s10, 4  ;;  %s452_s26 = scalar_lea.sflag [#allocation4], %s1062_s16  ;;  %s1166_s11 = int_to_ptr.vmem [resolvable:$true] %s468_s11 }
 0x114   : > { %v413_v34 = vsel %vm411_vm1, %v1083_v3, 0.0  ;;  %v412_v35 = vsel %vm410_vm2, %v1085_v4, 0.0  ;;  %v409_v44 = vadd.f32 %v408_v41, %v1090_v12  ;;  %s786_s28 = scalar_lea.vmem %s1166_s11, 16  ;;  %s870_s13 = smov [#allocation7]  }
 0x115   : > { %v414_v36 = vsel %vm360_vm0, %v413_v34, 0.0  ;;  %p787_p7 = scmp.ne.s32.totalorder %s1166_s11, %s786_s28  ;;  %s790_s23 = sshll.u32 %s870_s13, 4  ;;  %s791_s23 = int_to_ptr.vmem [resolvable:$false] %s790_s23 }
 0x116   : > { %v415_v37 = vadd.f32 %v414_v36, %v412_v35  ;;  %s792_s22 = scalar_lea.vmem %s791_s23, 32  ;;  %p793_p3 = scmp.lt.s32.totalorder %s1166_s11, %s791_s23 }
 0x117   : > { %p788_p10 = pnand %p787_p7, %p1227_p13  ;;  %p794_p8 = scmp.lt.s32.totalorder %s792_s22, %s786_s28 }
 0x118   : > { %v416_v38 = vrot.slane %v415_v37, 4 }
 0x119   : > { %p789_p11 = pneg %p788_p10  ;;  %p795_p0 = por %p794_p8, %p793_p3 }
 0x11a   : > { %v417_v40 = vadd.f32 %v416_v38, %v415_v37 }
 0x11b   : > { %p796_p2 = pnand %p795_p0, %p789_p11 }
 0x11c   : > { %v418_v42 = vrot.slane %v417_v40, 2 }
 0x11e   : > { %v419_v43 = vadd.f32 %v418_v42, %v417_v40 }
 0x120   : > { %v420_v45 = vrot.slane %v419_v43, 1 }
 0x122   : > { %v421_v46 = vadd.f32 %v420_v45, %v419_v43 }
 0x124   : > { %v422_v3 = vsub.f32 %v409_v44, %v421_v46 }
 0x126   : > { %v423_v4 = vmul.f32 %v1115_v25, %v422_v3 }
 0x128   : > { %449 = vst [vmem:[%s294_s10] sm:$0x1] %v423_v4 }
 0x129   : > { %799 = shalt.err (!%p796_p2)
}
 0x12a   : > { %s800_s16 = scalar_lea.hbm %s1164_s7, 16  ;;  %s804_s12 = scalar_lea.hbm %s1211_s4, 48 }
 0x12b   : > { %p801_p4 = scmp.ne.s32.totalorder %s1164_s7, %s800_s16  ;;  %p805_p1 = scmp.lt.u32.totalorder %s1164_s7, %s1211_s4 }
 0x12c   : > { %p806_p9 = scmp.lt.u32.totalorder %s804_s12, %s800_s16  ;;  %p808_p7 = scmp.lt.u32.totalorder %s800_s16, %s1164_s7 }
 0x12d   : > { %p802_p6 = pnand %p801_p4, %p1227_p13 }
 0x12e   : > { %p807_p5 = por %p806_p9, %p805_p1 }
 0x12f   : > { %p803_p12 = pneg %p802_p6 }
 0x130   : > { %p809_p10 = por %p808_p7, %p807_p5 }
 0x132   : > { %p810_p11 = pnand %p809_p10, %p803_p12 }
 0x134   : > { %813 = shalt.err (!%p810_p11)
}
 0x135   : > { %634 = dma.vmem_to_hbm [thread:$0]  (%p1227_p13), %s1166_s11, 16, %s1164_s7, %s452_s26  }
 0x136 PF: > { %p653_p3 = scmp.ge.s32.totalorder %s860_s21, 2  ;;  %s493_s8 = sand.u32 1, %s848_s18  }
 0x137   : > { %p1228_p8 = scmp.ne.s32.totalorder %s1220_s6, 0  ;;  %s494_s14 = scalar_lea.sflag [#allocation4], %s493_s8 }
 0x139   : > { %p646_p0 = pnand %p653_p3, %p1228_p8 }
 0x13b   : > { %839 = dma.done.wait (!%p646_p0), %s494_s14, 16  }
 0x13c   : > { %841 = vsyncadd (!%p646_p0), %s494_s14, 4294967280  ;;  %s502_s10 = scalar_lea.sflag [#allocation9], %s493_s8 }
 0x13d   : > { %843 = dma.done.wait (!%p646_p0), %s502_s10, 16  }
 0x13e   : > { %845 = vsyncadd (!%p646_p0), %s502_s10, 4294967280  ;;  %p25_p13 = scmp.ge.s32.totalorder %s926_s24, 5   ;;  %s1229_s18 = smov %s852_s19 }
 0x13f   : > { %s1230_s19 = smov %s856_s20  ;;  %s1231_s20 = smov %s938_s27 }
 0x140   : > { %s1232_s21 = smov %s926_s24  ;;  %27 = sbr.rel (!%p25_p13) target bundleno = 11 (0xb), region = 114 }
 0x147   :  { %506 = vsyncpa [#allocation3], 1 }
 0x148   :  { %508 = vsyncpa [#allocation3 + $0x1], 1 }
 0x149   :  { %509 = vsyncpa [#allocation6], 1 }
 0x14a   :  { %511 = vsyncpa [#allocation6 + $0x1], 1 }
 0x14b   :  { %512 = vsyncpa [#allocation4], 1 }
 0x14c   :  { %514 = vsyncpa [#allocation4 + $0x1], 1 }
 0x14d   :  { %515 = vsyncpa [#allocation9], 1 }
 0x14e   :  { %517 = vsyncpa [#allocation9 + $0x1], 1 }

</bundles_post_ra>
